<compile_context>
chip_gen: v7x
topology: tpu7x:2x2x1
jax: 0.10.0
libtpu: 0.0.40
codegen_flags: <defaults>
</compile_context>

<pallas_src>
import jax
import jax.numpy as jnp
import numpy as np
from jax.experimental import pallas as pl
from jax.experimental.pallas import tpu as pltpu


# ---------------------------------------------------------------------- kernel --

def _broadcast_kernel(pe_ref, out_ref):
    # pe_ref : (1, f_blk)        one lane-tile of the flattened PE row
    # out_ref: (b_blk, f_blk)    sublane-dense output block (batch on sublanes)
    out_ref[...] = jnp.broadcast_to(pe_ref[...], out_ref.shape)


# ------------------------------------------------------------------ chip params --

def _chip_block_params():
    """Returns (output_block_cap_bytes, is_multi_tensorcore_chip)."""
    vmem_bytes = None
    try:
        vmem_bytes = int(pltpu.get_tpu_info().vmem_capacity_bytes)
    except Exception:
        vmem_bytes = None
    if vmem_bytes is not None and vmem_bytes <= (64 << 20):
        # v7x-class: 64 MiB VMEM per TC, 2 TensorCores per chip.
        return 8 << 20, True
    if vmem_bytes is not None:
        # v5e / v6e: 128 MiB physical VMEM, single TensorCore.
        return 16 << 20, False
    # Unknown part: conservative cap, no forced multi-TC split.
    return 8 << 20, False


# -------------------------------------------------------------------- wrappers --

def learnable_pe_forward(pe, inputs):
    """init_mode == 'learnable': forward(x) is exactly the PE parameter (no kernel)."""
    del inputs
    return pe


def sincos_pe_forward(pe, inputs, *, force_pallas=False,
                      small_bytes_threshold=2 << 20):
    """init_mode == 'sincos': pe (S, D) broadcast to (B, S, D).

    Large outputs go through a sublane-dense Pallas copy kernel; tiny outputs
    (and the 'cannot tile' corner case) fall back to jnp.broadcast_to, which XLA
    typically fuses into the consumer for free.
    """
    b = inputs.shape[0]
    seq, dim = pe.shape
    flat = seq * dim
    itemsize = jnp.dtype(pe.dtype).itemsize
    total_out_bytes = b * flat * itemsize

    # Small-size fast path: launch + pipeline prologue would cost more than the copy.
    if not force_pallas and total_out_bytes <= small_bytes_threshold:
        return jnp.broadcast_to(pe[None], (b, seq, dim))

    block_cap, is_multi_tc = _chip_block_params()

    # ---- lane (flat) tiling: f_blk % 128 == 0, or the full row if it can't tile.
    if flat % 128 == 0:
        f_cap = max(128, ((block_cap // (8 * itemsize)) // 128) * 128)
        f_blk = int(min(flat, f_cap))
    else:
        f_blk = flat  # last block dim must equal the full array dim in this case
    nf = pl.cdiv(flat, f_blk)

    # Safety valve: if even the minimal (8-row, f_blk) block would blow VMEM
    # (only possible when flat is huge AND not a multiple of 128), don't use Pallas.
    if not force_pallas and min(b, 8) * f_blk * itemsize > 2 * block_cap:
        return jnp.broadcast_to(pe[None], (b, seq, dim))

    # ---- sublane (batch) tiling: multiple of 8, or the whole batch.
    row_block_bytes = f_blk * itemsize
    rows_cap = max(8, (int(block_cap // row_block_bytes) // 8) * 8)
    if b <= rows_cap:
        b_blk = b
    else:
        # Prefer a multiple-of-8 divisor of b (no masked partial block); bounded search.
        b_blk = rows_cap
        cand = rows_cap
        for _ in range(32):
            if cand >= 8 and b % cand == 0:
                b_blk = cand
                break
            cand -= 8
    nb = pl.cdiv(b, b_blk)

    # v7x only: give both TensorCores a batch block, but only when each core's
    # share is worth the extra ~0.35 us grid step.
    if is_multi_tc and nb == 1 and b >= 16 and total_out_bytes >= (4 << 20):
        half = ((((b + 1) // 2) + 7) // 8) * 8
        if 8 <= half < b:
            b_blk = half
            nb = pl.cdiv(b, b_blk)

    # ---- VMEM budget: 2x double-buffered output block + 2x (sublane-padded) PE block.
    out_block_bytes = b_blk * f_blk * itemsize
    pe_block_bytes = 8 * f_blk * itemsize          # (1, f_blk) pads to 8 sublanes
    vmem_limit = int(min(48 << 20,
                         max(4 << 20,
                             2 * out_block_bytes + 2 * pe_block_bytes + (1 << 20))))

    pe_flat = pe.reshape(1, flat)                  # metadata-only, row-major

    out_flat = pl.pallas_call(
        _broadcast_kernel,
        out_shape=jax.ShapeDtypeStruct((b, flat), pe.dtype),
        grid_spec=pltpu.PrefetchScalarGridSpec(
            num_scalar_prefetch=0,
            grid=(nb, nf),
            in_specs=[pl.BlockSpec((1, f_blk), lambda i, j: (0, j))],
            out_specs=pl.BlockSpec((b_blk, f_blk), lambda i, j: (i, j)),
        ),
        compiler_params=pltpu.CompilerParams(
            dimension_semantics=("parallel", "parallel"),
            vmem_limit_bytes=vmem_limit,
        ),
        cost_estimate=pl.CostEstimate(
            flops=0,
            transcendentals=0,
            bytes_accessed=int(flat * itemsize + total_out_bytes),
        ),
    )(pe_flat)

    # Metadata-only reshape (row-major contiguous) back to (B, S, D).
    return out_flat.reshape(b, seq, dim)


# ------------------------------------------------------------ parameter builders --

def make_learnable_pe(key, shape):
    # Mirrors torch.randn(shape) * 0.02 (deterministic via PRNGKey).
    return jax.random.normal(key, shape, dtype=jnp.float32) * 0.02


def get_2d_sincos_pos_embed(embed_dim, grid_size):
    # Mirrors the module's numpy construction exactly.
    assert embed_dim % 2 == 0
    pos = np.arange(grid_size, dtype=np.float32)
    omega = np.arange(embed_dim // 2, dtype=np.float32) / (embed_dim / 2.0)
    omega = 1.0 / 10000 ** omega
    out = np.einsum('m,d->md', pos.reshape(-1), omega)
    emb = np.concatenate([np.sin(out), np.cos(out)], axis=1)
    return jnp.asarray(emb, dtype=jnp.float32)


# ------------------------------------------------------------------------- main --

if __name__ == "__main__":
    key = jax.random.PRNGKey(0)
    k_pe, k_x = jax.random.split(key)

    # Module-consistent small shapes: PE shape (seq=8, hidden=32); batch=2.
    pe_shape = (8, 32)
    x = jax.random.normal(k_x, (2,) + pe_shape, dtype=jnp.float32)

    # --- learnable mode: forward(x) == pe (no batching; no kernel by design) -----
    pe_learnable = make_learnable_pe(k_pe, pe_shape)
    out_learnable = jax.block_until_ready(learnable_pe_forward(pe_learnable, x))
    assert out_learnable.shape == pe_shape
    np.testing.assert_array_equal(np.asarray(out_learnable), np.asarray(pe_learnable))

    # --- sincos mode: forward(x) == pe broadcast to (B, S, D) --------------------
    # module builds pe of shape (int(sqrt(shape[0])), shape[-1]) with shape=(64, 32)
    pe_sincos = get_2d_sincos_pos_embed(embed_dim=32, grid_size=int(64 ** 0.5))
    ref = np.broadcast_to(np.asarray(pe_sincos),
                          (x.shape[0],) + pe_sincos.shape)

    # Default path for this tiny output: jnp.broadcast_to fast path (no kernel).
    out_fast = jax.block_until_ready(sincos_pe_forward(pe_sincos, x))
    assert out_fast.shape == (x.shape[0],) + pe_sincos.shape
    np.testing.assert_array_equal(np.asarray(out_fast), ref)

    # Forced Pallas path so the kernel itself compiles and runs on TPU.
    out_pallas = jax.block_until_ready(
        sincos_pe_forward(pe_sincos, x, force_pallas=True))
    assert out_pallas.shape == (x.shape[0],) + pe_sincos.shape
    np.testing.assert_array_equal(np.asarray(out_pallas), ref)

    print("KERNEL_OK")
</pallas_src>

<mosaic_0001>
module attributes {stable_mosaic.version = 11 : i64} {
  func.func @_broadcast_kernel(%arg0: i32, %arg1: i32, %arg2: memref<1x256xf32, #tpu.memory_space<vmem>>, %arg3: memref<2x256xf32, #tpu.memory_space<vmem>>) attributes {dimension_semantics = [#tpu.dimension_semantics<parallel>, #tpu.dimension_semantics<parallel>], iteration_bounds = array<i64: 1, 1>, scalar_prefetch = 0 : i64, scratch_operands = 0 : i64, tpu.core_type = #tpu.core_type<tc>, window_params = [{transform_indices = @transform_0, window_bounds = array<i64: 1, 256>}, {transform_indices = @transform_1, window_bounds = array<i64: 2, 256>}]} {
    %c0 = arith.constant 0 : index
    %c0_0 = arith.constant 0 : index
    %0 = vector.load %arg2[%c0, %c0_0] : memref<1x256xf32, #tpu.memory_space<vmem>>, vector<1x256xf32>
    %1 = vector.shape_cast %0 : vector<1x256xf32> to vector<1x256xf32>
    %2 = vector.broadcast %1 : vector<1x256xf32> to vector<2x256xf32>
    %c0_1 = arith.constant 0 : index
    %c0_2 = arith.constant 0 : index
    %3 = vector.load %arg3[%c0_1, %c0_2] : memref<2x256xf32, #tpu.memory_space<vmem>>, vector<2x256xf32>
    tpu.vector_store %arg3[%c0_1, %c0_2], %2 {strides = array<i32>} : memref<2x256xf32, #tpu.memory_space<vmem>>, vector<2x256xf32>,
    return
  }
  func.func @transform_0(%arg0: i32, %arg1: i32) -> (i32, i32) {
    %c0_i32 = arith.constant 0 : i32
    %c0_i32_0 = arith.constant 0 : i32
    return %c0_i32, %arg1 : i32, i32
  }
  func.func @transform_1(%arg0: i32, %arg1: i32) -> (i32, i32) {
    %c0_i32 = arith.constant 0 : i32
    return %arg0, %arg1 : i32, i32
  }
}

</mosaic_0001>

<bundles_post_ra>
// kernel: tpu_custom_call.1
= control target key start
LH: loop header
LB: loop body
LE: loop exit
PB: predicated region body
PF: predicated region fallthrough
CT: control target
= control target key end

     0   :  { %6 = vsyncpa [#allocation3], 0  ;;  %s143_s0 = inlined_call_operand.hbm [shape: f32[1,256], index: 0, kind: input, shape index: {}]   ;;  %s144_s1 = inlined_call_operand.hbm [shape: f32[2,256], index: 1, kind: output, shape index: {}]  }
   0x1   :  { %7 = vsyncpa [#allocation4], 0  ;;  %s107_s6 = smov [#allocation2]   ;;  %s59_s10 = scalar_lea.hbm %s143_s0, 32 }
   0x2   :  { %s14_s7 = sshll.u32 %s107_s6, 4  ;;  %p60_p0 = scmp.ne.s32.totalorder %s143_s0, %s59_s10  ;;  %s15_s7 = int_to_ptr.vmem [resolvable:$true] %s14_s7 }
   0x3   :  { %p63_p1 = scmp.lt.u32.totalorder %s59_s10, %s143_s0 }
   0x5   :  { %p65_p2 = pnand %p63_p1, %p60_p0 }
   0x7   :  { %68 = shalt.err (!%p65_p2)
}
   0x8   :  { %s69_s15 = scalar_lea.vmem %s15_s7, 32  ;;  %p74_p4 = scmp.lt.s32.totalorder %s15_s7, %s15_s7 }
   0x9   :  { %p70_p3 = scmp.ne.s32.totalorder %s15_s7, %s69_s15  ;;  %p75_p5 = scmp.lt.s32.totalorder %s69_s15, %s69_s15 }
   0xb   :  { %p76_p6 = por %p75_p5, %p74_p4 }
   0xd   :  { %p77_p7 = pnand %p76_p6, %p70_p3 }
   0xf   :  { %80 = shalt.err (!%p77_p7)
}
  0x10   :  { %17 = dma.hbm_to_vmem [thread:$0]  %s143_s0, 32, %s15_s7, [#allocation3]  }
  0x11   :  { %103 = dma.done.wait [#allocation3], 32  }
  0x12   :  { %104 = vsyncadd [#allocation3], 4294967264  ;;  %v23_v0 = vlaneseq  ;;  %v21_v4 = vld [vmem:[#allocation2] sm:$0x3]  ;;  %s108_s18 = smov [#allocation5]  }
  0x13   :  { %s47_s19 = sshll.u32 %s108_s18, 4  ;;  %s48_s19 = int_to_ptr.vmem [resolvable:$true] %s47_s19 }
  0x14   :  { %v24_v1 = vshrl.u32 %v23_v0, 7  ;;  %s81_s20 = scalar_lea.vmem %s48_s19, 64  ;;  %p86_p9 = scmp.lt.s32.totalorder %s48_s19, %s48_s19 }
  0x15   :  { %p82_p8 = scmp.ne.s32.totalorder %s48_s19, %s81_s20  ;;  %p87_p10 = scmp.lt.s32.totalorder %s81_s20, %s81_s20 }
  0x16   :  { %v25_v2 = vsub.s32 0, %v24_v1  ;;  %v29_v3 = vsub.s32 1, %v24_v1 }
  0x17   :  { %p88_p11 = por %p87_p10, %p86_p9 }
  0x18   :  { %v26_v5 = vrot.slane %v21_v4, %v25_v2  ;;  %v30_v6 = vrot.slane %v21_v4, %v29_v3 }
  0x19   :  { %p89_p12 = pnand %p88_p11, %p82_p8 }
  0x1a   :  { %v31_v7 = vcombine.low %v26_v5, %v30_v6 }
  0x1c   :  { %56 = vst.sshfl [vmem:[#allocation5] sm:$0x33 pattern:$0x76325410] %v31_v7 }
  0x1d   :  { %92 = shalt.err (!%p89_p12)
}
  0x1e   :  { %s93_s22 = scalar_lea.hbm %s144_s1, 64 }
  0x1f   :  { %p94_p13 = scmp.ne.s32.totalorder %s144_s1, %s93_s22  ;;  %p97_p0 = scmp.lt.u32.totalorder %s93_s22, %s144_s1 }
  0x21   :  { %p99_p1 = pnand %p97_p0, %p94_p13 }
  0x23   :  { %102 = shalt.err (!%p99_p1)
}
  0x24   :  { %50 = dma.vmem_to_hbm [thread:$0]  %s48_s19, 64, %s144_s1, [#allocation4]  }
  0x25   :  { %105 = dma.done.wait [#allocation4], 64  }
  0x26   :  { %106 = vsyncadd [#allocation4], 4294967232 }
  0x27   :  { %54 = vsyncpa [#allocation3], 1 }
  0x28   :  { %55 = vsyncpa [#allocation4], 1 }

</bundles_post_ra>
